<compile_context>
chip_gen: v7x
topology: tpu7x:2x2x1
jax: 0.10.0
libtpu: 0.0.40
codegen_flags: <defaults>
</compile_context>

<pallas_src>
import functools

import jax
import jax.numpy as jnp
from jax import lax
from jax.experimental import pallas as pl
from jax.experimental.pallas import tpu as pltpu


def unet_up_kernel(x_ref, u_ref, wb_ref, b_ref, gamma_ref, beta_ref, p_ref,
                   alpha_ref, o_ref, *, k, pad, L, cg, bn, same_channels,
                   eps_gn):
    # x_ref    : (bn, Cin, L0)   raw (not upsampled, not padded) input block
    # u_ref    : (k, L0, L)      fused upsample+zero-pad+shift selection per tap
    # wb_ref   : (Cout, k*Cin)   weight-standardized conv weights, taps flattened
    # b_ref    : (Cout, 1)  gamma/beta: (Cout, 1)
    # p_ref    : (Cout, Cout)    group-sum projector (1 where same group)
    # alpha_ref: (1,) in SMEM    shared PReLU slope
    # o_ref    : (bn, Cout, L)   lane-dense NCL output block
    alpha = alpha_ref[0]
    wb = wb_ref[...]
    bias = b_ref[...]
    gamma = gamma_ref[...]
    beta = beta_ref[...]
    proj = p_ref[...]
    inv_denom = 1.0 / float(L * cg)

    for bi in range(bn):                      # small, unrolled batch loop
        x0 = x_ref[bi]                        # (Cin, L0)

        # Nearest upsample + zero pad + tap shift, fused into one matmul per tap.
        parts = [jnp.dot(x0, u_ref[dk], preferred_element_type=jnp.float32)
                 for dk in range(k)]          # each (Cin, L)
        xcat = jnp.concatenate(parts, axis=0)                 # (k*Cin, L) im2col

        # Conv1d as a single MXU matmul (contraction over k*Cin).
        acc = jnp.dot(wb, xcat, preferred_element_type=jnp.float32)  # (Cout, L)
        acc = acc + bias

        # GroupNorm: single pass over the tile; group combine via one projector.
        s1 = jnp.sum(acc, axis=1, keepdims=True)              # (Cout, 1)
        s2 = jnp.sum(acc * acc, axis=1, keepdims=True)        # (Cout, 1)
        gsum = jnp.dot(proj, s1, preferred_element_type=jnp.float32)
        gsq = jnp.dot(proj, s2, preferred_element_type=jnp.float32)
        mean_c = gsum * inv_denom
        var_c = jnp.maximum(gsq * inv_denom - mean_c * mean_c, 0.0)
        y = (acc - mean_c) * lax.rsqrt(var_c + eps_gn)
        y = y * gamma + beta

        # PReLU with a single shared alpha (PyTorch nn.PReLU() default).
        y = jnp.where(y >= 0, y, alpha * y)

        # Residual branch: the zero-shift tap (dk == pad) IS the upsampled x.
        if same_channels:
            y = (parts[pad] + y) * 0.5

        o_ref[bi] = y.astype(o_ref.dtype)


def _pick_batch_block(n, cap=8):
    for bn in range(min(n, cap), 0, -1):
        if n % bn == 0:
            return bn
    return 1


def unet_up_forward(x, w, b, gamma, beta, alpha, *, kernel_size, gn, factor):
    """x: (N, Cin, L0) float32 (PyTorch NCL). Returns (N, Cout, L0*factor) NCL."""
    N, Cin, L0 = x.shape
    Cout = w.shape[0]
    k = kernel_size
    pad = (k - 1) // 2                        # get_padding(k, dilation=1)
    L = L0 * factor
    if Cout % gn != 0:
        raise ValueError(f"gn={gn} must divide out_channels={Cout}")
    cg = Cout // gn
    same = (Cin == Cout)

    # --- tiny host-side prep (no full-tensor HBM passes on x) ---
    # Weight standardization (O(Cout*Cin*k), negligible).
    eps_w = 1e-5
    w_mean = jnp.mean(w, axis=(1, 2), keepdims=True)
    w_var = jnp.mean((w - w_mean) ** 2, axis=(1, 2), keepdims=True)
    w_std = (w - w_mean) * lax.rsqrt(w_var + eps_w)            # (Cout, Cin, k)
    wb = jnp.transpose(w_std, (0, 2, 1)).reshape(Cout, k * Cin)  # (Cout, k*Cin)

    # Fused upsample + zero-pad + shift selection matrices, one per tap:
    # U[dk, i, l] = 1  iff  x_pad[:, l+dk] == x0[:, i]  (0 in the pad region).
    l_idx = jnp.arange(L)[None, :]
    i_idx = jnp.arange(L0)[:, None]
    u_taps = []
    for dk in range(k):
        src = l_idx + (dk - pad)                               # index into x_up
        valid = (src >= 0) & (src < L)
        u_taps.append((((src // factor) == i_idx) & valid).astype(jnp.float32))
    U = jnp.stack(u_taps, axis=0)                              # (k, L0, L)

    # Group-sum projector: P[c, c'] = 1 if channels c, c' share a group.
    grp = jnp.arange(Cout) // cg
    P = (grp[:, None] == grp[None, :]).astype(jnp.float32)     # (Cout, Cout)

    b2 = b.reshape(Cout, 1).astype(jnp.float32)
    gamma2 = gamma.reshape(Cout, 1).astype(jnp.float32)
    beta2 = beta.reshape(Cout, 1).astype(jnp.float32)
    alpha1 = jnp.asarray(alpha, jnp.float32).reshape(1)        # SMEM scalar

    bn = _pick_batch_block(N)
    grid = (N // bn,)

    kern = functools.partial(unet_up_kernel, k=k, pad=pad, L=L, cg=cg, bn=bn,
                             same_channels=same, eps_gn=1e-5)

    out = pl.pallas_call(
        kern,
        out_shape=jax.ShapeDtypeStruct((N, Cout, L), x.dtype),
        grid_spec=pltpu.PrefetchScalarGridSpec(
            num_scalar_prefetch=0,
            grid=grid,
            in_specs=[
                pl.BlockSpec((bn, Cin, L0), lambda n: (n, 0, 0)),
                pl.BlockSpec((k, L0, L), lambda n: (0, 0, 0)),
                pl.BlockSpec((Cout, k * Cin), lambda n: (0, 0)),
                pl.BlockSpec((Cout, 1), lambda n: (0, 0)),
                pl.BlockSpec((Cout, 1), lambda n: (0, 0)),
                pl.BlockSpec((Cout, 1), lambda n: (0, 0)),
                pl.BlockSpec((Cout, Cout), lambda n: (0, 0)),
                pl.BlockSpec(memory_space=pltpu.MemorySpace.SMEM),
            ],
            out_specs=pl.BlockSpec((bn, Cout, L), lambda n: (n, 0, 0)),
        ),
        compiler_params=pltpu.CompilerParams(
            dimension_semantics=("parallel",)),
    )(x, U, wb, b2, gamma2, beta2, P, alpha1)

    return out                                                 # already NCL


def unet_up_reference(x, w, b, gamma, beta, alpha, *, kernel_size, gn, factor):
    """Pure-JAX reference mirroring the PyTorch module."""
    k = kernel_size
    pad = (k - 1) // 2
    x_up = jnp.repeat(x, factor, axis=2)
    w_mean = jnp.mean(w, axis=(1, 2), keepdims=True)
    w_var = jnp.mean((w - w_mean) ** 2, axis=(1, 2), keepdims=True)
    w_std = (w - w_mean) * lax.rsqrt(w_var + 1e-5)
    y = lax.conv_general_dilated(x_up, w_std, window_strides=(1,),
                                 padding=[(pad, pad)],
                                 dimension_numbers=("NCH", "OIH", "NCH"))
    y = y + b[None, :, None]
    N, Cout, L = y.shape
    yg = y.reshape(N, gn, Cout // gn, L)
    m = jnp.mean(yg, axis=(2, 3), keepdims=True)
    v = jnp.mean((yg - m) ** 2, axis=(2, 3), keepdims=True)
    yg = (yg - m) * lax.rsqrt(v + 1e-5)
    y = yg.reshape(N, Cout, L) * gamma[None, :, None] + beta[None, :, None]
    y = jnp.where(y >= 0, y, alpha * y)
    if x.shape[1] == Cout:
        y = (x_up + y) / 2
    return y


if __name__ == "__main__":
    # Small shapes consistent with the module: UnetUp(in=8, out=8, k=3, gn=8, factor=2)
    N, Cin, Cout, L0, K, GN, FACTOR = 2, 8, 8, 16, 3, 8, 2

    key = jax.random.PRNGKey(0)
    kx, kw, kb, kg, kbe = jax.random.split(key, 5)
    x = jax.random.normal(kx, (N, Cin, L0), jnp.float32)
    w = jax.random.normal(kw, (Cout, Cin, K), jnp.float32) * 0.1
    b = jax.random.normal(kb, (Cout,), jnp.float32) * 0.1
    gamma = 1.0 + 0.1 * jax.random.normal(kg, (Cout,), jnp.float32)
    beta = 0.1 * jax.random.normal(kbe, (Cout,), jnp.float32)
    alpha = jnp.float32(0.25)   # PyTorch nn.PReLU() default init

    out = unet_up_forward(x, w, b, gamma, beta, alpha,
                          kernel_size=K, gn=GN, factor=FACTOR)
    out = jax.block_until_ready(out)

    ref = unet_up_reference(x, w, b, gamma, beta, alpha,
                            kernel_size=K, gn=GN, factor=FACTOR)
    assert out.shape == (N, Cout, L0 * FACTOR)
    assert jnp.max(jnp.abs(out - ref)) < 2e-4, "mismatch vs pure-JAX reference"

    print("KERNEL_OK")
</pallas_src>

<mosaic_0001>
module attributes {stable_mosaic.version = 11 : i64} {
  func.func @unet_up_kernel(%arg0: i32, %arg1: memref<2x8x16xf32, #tpu.memory_space<vmem>>, %arg2: memref<3x16x32xf32, #tpu.memory_space<vmem>>, %arg3: memref<8x24xf32, #tpu.memory_space<vmem>>, %arg4: memref<8x1xf32, #tpu.memory_space<vmem>>, %arg5: memref<8x1xf32, #tpu.memory_space<vmem>>, %arg6: memref<8x1xf32, #tpu.memory_space<vmem>>, %arg7: memref<8x8xf32, #tpu.memory_space<vmem>>, %arg8: memref<1xf32, #tpu.memory_space<smem>>, %arg9: memref<2x8x32xf32, #tpu.memory_space<vmem>>) attributes {dimension_semantics = [#tpu.dimension_semantics<parallel>], iteration_bounds = array<i64: 1>, scalar_prefetch = 0 : i64, scratch_operands = 0 : i64, tpu.core_type = #tpu.core_type<tc>, window_params = [{transform_indices = @transform_0, window_bounds = array<i64: 2, 8, 16>}, {pipeline_mode = #tpu.pipeline_mode<synchronous>, transform_indices = @transform_1, window_bounds = array<i64: 3, 16, 32>}, {pipeline_mode = #tpu.pipeline_mode<synchronous>, transform_indices = @transform_2, window_bounds = array<i64: 8, 24>}, {pipeline_mode = #tpu.pipeline_mode<synchronous>, transform_indices = @transform_3, window_bounds = array<i64: 8, 1>}, {pipeline_mode = #tpu.pipeline_mode<synchronous>, transform_indices = @transform_4, window_bounds = array<i64: 8, 1>}, {pipeline_mode = #tpu.pipeline_mode<synchronous>, transform_indices = @transform_5, window_bounds = array<i64: 8, 1>}, {pipeline_mode = #tpu.pipeline_mode<synchronous>, transform_indices = @transform_6, window_bounds = array<i64: 8, 8>}, {transform_indices = @transform_7, window_bounds = array<i64: 1>}, {transform_indices = @transform_8, window_bounds = array<i64: 2, 8, 32>}]} {
    %c0 = arith.constant 0 : index
    %0 = memref.load %arg8[%c0] : memref<1xf32, #tpu.memory_space<smem>>
    %c0_0 = arith.constant 0 : index
    %c0_1 = arith.constant 0 : index
    %1 = vector.load %arg3[%c0_0, %c0_1] : memref<8x24xf32, #tpu.memory_space<vmem>>, vector<8x24xf32>
    %c0_2 = arith.constant 0 : index
    %c0_3 = arith.constant 0 : index
    %2 = vector.load %arg4[%c0_2, %c0_3] : memref<8x1xf32, #tpu.memory_space<vmem>>, vector<8x1xf32>
    %c0_4 = arith.constant 0 : index
    %c0_5 = arith.constant 0 : index
    %3 = vector.load %arg5[%c0_4, %c0_5] : memref<8x1xf32, #tpu.memory_space<vmem>>, vector<8x1xf32>
    %c0_6 = arith.constant 0 : index
    %c0_7 = arith.constant 0 : index
    %4 = vector.load %arg6[%c0_6, %c0_7] : memref<8x1xf32, #tpu.memory_space<vmem>>, vector<8x1xf32>
    %c0_8 = arith.constant 0 : index
    %c0_9 = arith.constant 0 : index
    %5 = vector.load %arg7[%c0_8, %c0_9] : memref<8x8xf32, #tpu.memory_space<vmem>>, vector<8x8xf32>
    %c0_10 = arith.constant 0 : index
    %c0_11 = arith.constant 0 : index
    %c0_12 = arith.constant 0 : index
    %6 = vector.load %arg1[%c0_10, %c0_11, %c0_12] : memref<2x8x16xf32, #tpu.memory_space<vmem>>, vector<1x8x16xf32>
    %7 = vector.shape_cast %6 : vector<1x8x16xf32> to vector<8x16xf32>
    %c0_13 = arith.constant 0 : index
    %c0_14 = arith.constant 0 : index
    %c0_15 = arith.constant 0 : index
    %8 = vector.load %arg2[%c0_13, %c0_14, %c0_15] : memref<3x16x32xf32, #tpu.memory_space<vmem>>, vector<1x16x32xf32>
    %9 = vector.shape_cast %8 : vector<1x16x32xf32> to vector<16x32xf32>
    %cst = arith.constant dense<0.000000e+00> : vector<8x32xf32>
    %10 = tpu.matmul %7, %9, %cst {dimension_numbers = #tpu.dot_dimension_numbers<[1], [0], [0], [1], [0, 0, 1, 1], [], []>} : vector<8x16xf32>, vector<16x32xf32>, vector<8x32xf32> -> vector<8x32xf32>
    %c1 = arith.constant 1 : index
    %c0_16 = arith.constant 0 : index
    %c0_17 = arith.constant 0 : index
    %11 = vector.load %arg2[%c1, %c0_16, %c0_17] : memref<3x16x32xf32, #tpu.memory_space<vmem>>, vector<1x16x32xf32>
    %12 = vector.shape_cast %11 : vector<1x16x32xf32> to vector<16x32xf32>
    %cst_18 = arith.constant dense<0.000000e+00> : vector<8x32xf32>
    %13 = tpu.matmul %7, %12, %cst_18 {dimension_numbers = #tpu.dot_dimension_numbers<[1], [0], [0], [1], [0, 0, 1, 1], [], []>} : vector<8x16xf32>, vector<16x32xf32>, vector<8x32xf32> -> vector<8x32xf32>
    %c2 = arith.constant 2 : index
    %c0_19 = arith.constant 0 : index
    %c0_20 = arith.constant 0 : index
    %14 = vector.load %arg2[%c2, %c0_19, %c0_20] : memref<3x16x32xf32, #tpu.memory_space<vmem>>, vector<1x16x32xf32>
    %15 = vector.shape_cast %14 : vector<1x16x32xf32> to vector<16x32xf32>
    %cst_21 = arith.constant dense<0.000000e+00> : vector<8x32xf32>
    %16 = tpu.matmul %7, %15, %cst_21 {dimension_numbers = #tpu.dot_dimension_numbers<[1], [0], [0], [1], [0, 0, 1, 1], [], []>} : vector<8x16xf32>, vector<16x32xf32>, vector<8x32xf32> -> vector<8x32xf32>
    %17 = tpu.concatenate %10, %13, %16 in 0 : vector<8x32xf32>, vector<8x32xf32>, vector<8x32xf32> -> vector<24x32xf32>
    %cst_22 = arith.constant dense<0.000000e+00> : vector<8x32xf32>
    %18 = tpu.matmul %1, %17, %cst_22 {dimension_numbers = #tpu.dot_dimension_numbers<[1], [0], [0], [1], [0, 0, 1, 1], [], []>} : vector<8x24xf32>, vector<24x32xf32>, vector<8x32xf32> -> vector<8x32xf32>
    %19 = vector.broadcast %2 : vector<8x1xf32> to vector<8x32xf32>
    %20 = arith.addf %18, %19 : vector<8x32xf32>
    %cst_23 = arith.constant dense<0.000000e+00> : vector<8xf32>
    %21 = vector.multi_reduction <add>, %20, %cst_23 [1] : vector<8x32xf32> to vector<8xf32>
    %22 = vector.shape_cast %21 : vector<8xf32> to vector<8x1xf32>
    %23 = arith.mulf %20, %20 : vector<8x32xf32>
    %cst_24 = arith.constant dense<0.000000e+00> : vector<8xf32>
    %24 = vector.multi_reduction <add>, %23, %cst_24 [1] : vector<8x32xf32> to vector<8xf32>
    %25 = vector.shape_cast %24 : vector<8xf32> to vector<8x1xf32>
    %cst_25 = arith.constant dense<0.000000e+00> : vector<8x1xf32>
    %26 = tpu.matmul %5, %22, %cst_25 {dimension_numbers = #tpu.dot_dimension_numbers<[1], [0], [0], [1], [0, 0, 1, 1], [], []>} : vector<8x8xf32>, vector<8x1xf32>, vector<8x1xf32> -> vector<8x1xf32>
    %cst_26 = arith.constant dense<0.000000e+00> : vector<8x1xf32>
    %27 = tpu.matmul %5, %25, %cst_26 {dimension_numbers = #tpu.dot_dimension_numbers<[1], [0], [0], [1], [0, 0, 1, 1], [], []>} : vector<8x8xf32>, vector<8x1xf32>, vector<8x1xf32> -> vector<8x1xf32>
    %cst_27 = arith.constant 3.125000e-02 : f32
    %28 = vector.broadcast %cst_27 : f32 to vector<8x1xf32>
    %29 = arith.mulf %26, %28 : vector<8x1xf32>
    %cst_28 = arith.constant 3.125000e-02 : f32
    %30 = vector.broadcast %cst_28 : f32 to vector<8x1xf32>
    %31 = arith.mulf %27, %30 : vector<8x1xf32>
    %32 = arith.mulf %29, %29 : vector<8x1xf32>
    %33 = arith.subf %31, %32 : vector<8x1xf32>
    %cst_29 = arith.constant 0.000000e+00 : f32
    %34 = vector.broadcast %cst_29 : f32 to vector<8x1xf32>
    %35 = arith.maximumf %33, %34 : vector<8x1xf32>
    %36 = vector.broadcast %29 : vector<8x1xf32> to vector<8x32xf32>
    %37 = arith.subf %20, %36 : vector<8x32xf32>
    %cst_30 = arith.constant 9.99999974E-6 : f32
    %38 = vector.broadcast %cst_30 : f32 to vector<8x1xf32>
    %39 = arith.addf %35, %38 : vector<8x1xf32>
    %40 = math.rsqrt %39 : vector<8x1xf32>
    %41 = vector.broadcast %40 : vector<8x1xf32> to vector<8x32xf32>
    %42 = arith.mulf %37, %41 : vector<8x32xf32>
    %43 = vector.broadcast %3 : vector<8x1xf32> to vector<8x32xf32>
    %44 = arith.mulf %42, %43 : vector<8x32xf32>
    %45 = vector.broadcast %4 : vector<8x1xf32> to vector<8x32xf32>
    %46 = arith.addf %44, %45 : vector<8x32xf32>
    %cst_31 = arith.constant 0.000000e+00 : f32
    %47 = vector.broadcast %cst_31 : f32 to vector<8x32xf32>
    %48 = arith.cmpf oge, %46, %47 : vector<8x32xf32>
    %49 = vector.broadcast %0 : f32 to vector<8x32xf32>
    %50 = arith.mulf %49, %46 : vector<8x32xf32>
    %51 = arith.select %48, %46, %50 : vector<8x32xi1>, vector<8x32xf32>
    %52 = arith.addf %13, %51 : vector<8x32xf32>
    %cst_32 = arith.constant 5.000000e-01 : f32
    %53 = vector.broadcast %cst_32 : f32 to vector<8x32xf32>
    %54 = arith.mulf %52, %53 : vector<8x32xf32>
    %c0_33 = arith.constant 0 : index
    %c0_34 = arith.constant 0 : index
    %c0_35 = arith.constant 0 : index
    %55 = vector.load %arg9[%c0_33, %c0_34, %c0_35] : memref<2x8x32xf32, #tpu.memory_space<vmem>>, vector<1x8x32xf32>
    %56 = vector.shape_cast %55 : vector<1x8x32xf32> to vector<8x32xf32>
    %57 = vector.shape_cast %54 : vector<8x32xf32> to vector<1x8x32xf32>
    tpu.vector_store %arg9[%c0_33, %c0_34, %c0_35], %57 {strides = array<i32>} : memref<2x8x32xf32, #tpu.memory_space<vmem>>, vector<1x8x32xf32>,
    %c1_36 = arith.constant 1 : index
    %c0_37 = arith.constant 0 : index
    %c0_38 = arith.constant 0 : index
    %58 = vector.load %arg1[%c1_36, %c0_37, %c0_38] : memref<2x8x16xf32, #tpu.memory_space<vmem>>, vector<1x8x16xf32>
    %59 = vector.shape_cast %58 : vector<1x8x16xf32> to vector<8x16xf32>
    %c0_39 = arith.constant 0 : index
    %c0_40 = arith.constant 0 : index
    %c0_41 = arith.constant 0 : index
    %60 = vector.load %arg2[%c0_39, %c0_40, %c0_41] : memref<3x16x32xf32, #tpu.memory_space<vmem>>, vector<1x16x32xf32>
    %61 = vector.shape_cast %60 : vector<1x16x32xf32> to vector<16x32xf32>
    %cst_42 = arith.constant dense<0.000000e+00> : vector<8x32xf32>
    %62 = tpu.matmul %59, %61, %cst_42 {dimension_numbers = #tpu.dot_dimension_numbers<[1], [0], [0], [1], [0, 0, 1, 1], [], []>} : vector<8x16xf32>, vector<16x32xf32>, vector<8x32xf32> -> vector<8x32xf32>
    %c1_43 = arith.constant 1 : index
    %c0_44 = arith.constant 0 : index
    %c0_45 = arith.constant 0 : index
    %63 = vector.load %arg2[%c1_43, %c0_44, %c0_45] : memref<3x16x32xf32, #tpu.memory_space<vmem>>, vector<1x16x32xf32>
    %64 = vector.shape_cast %63 : vector<1x16x32xf32> to vector<16x32xf32>
    %cst_46 = arith.constant dense<0.000000e+00> : vector<8x32xf32>
    %65 = tpu.matmul %59, %64, %cst_46 {dimension_numbers = #tpu.dot_dimension_numbers<[1], [0], [0], [1], [0, 0, 1, 1], [], []>} : vector<8x16xf32>, vector<16x32xf32>, vector<8x32xf32> -> vector<8x32xf32>
    %c2_47 = arith.constant 2 : index
    %c0_48 = arith.constant 0 : index
    %c0_49 = arith.constant 0 : index
    %66 = vector.load %arg2[%c2_47, %c0_48, %c0_49] : memref<3x16x32xf32, #tpu.memory_space<vmem>>, vector<1x16x32xf32>
    %67 = vector.shape_cast %66 : vector<1x16x32xf32> to vector<16x32xf32>
    %cst_50 = arith.constant dense<0.000000e+00> : vector<8x32xf32>
    %68 = tpu.matmul %59, %67, %cst_50 {dimension_numbers = #tpu.dot_dimension_numbers<[1], [0], [0], [1], [0, 0, 1, 1], [], []>} : vector<8x16xf32>, vector<16x32xf32>, vector<8x32xf32> -> vector<8x32xf32>
    %69 = tpu.concatenate %62, %65, %68 in 0 : vector<8x32xf32>, vector<8x32xf32>, vector<8x32xf32> -> vector<24x32xf32>
    %cst_51 = arith.constant dense<0.000000e+00> : vector<8x32xf32>
    %70 = tpu.matmul %1, %69, %cst_51 {dimension_numbers = #tpu.dot_dimension_numbers<[1], [0], [0], [1], [0, 0, 1, 1], [], []>} : vector<8x24xf32>, vector<24x32xf32>, vector<8x32xf32> -> vector<8x32xf32>
    %71 = vector.broadcast %2 : vector<8x1xf32> to vector<8x32xf32>
    %72 = arith.addf %70, %71 : vector<8x32xf32>
    %cst_52 = arith.constant dense<0.000000e+00> : vector<8xf32>
    %73 = vector.multi_reduction <add>, %72, %cst_52 [1] : vector<8x32xf32> to vector<8xf32>
    %74 = vector.shape_cast %73 : vector<8xf32> to vector<8x1xf32>
    %75 = arith.mulf %72, %72 : vector<8x32xf32>
    %cst_53 = arith.constant dense<0.000000e+00> : vector<8xf32>
    %76 = vector.multi_reduction <add>, %75, %cst_53 [1] : vector<8x32xf32> to vector<8xf32>
    %77 = vector.shape_cast %76 : vector<8xf32> to vector<8x1xf32>
    %cst_54 = arith.constant dense<0.000000e+00> : vector<8x1xf32>
    %78 = tpu.matmul %5, %74, %cst_54 {dimension_numbers = #tpu.dot_dimension_numbers<[1], [0], [0], [1], [0, 0, 1, 1], [], []>} : vector<8x8xf32>, vector<8x1xf32>, vector<8x1xf32> -> vector<8x1xf32>
    %cst_55 = arith.constant dense<0.000000e+00> : vector<8x1xf32>
    %79 = tpu.matmul %5, %77, %cst_55 {dimension_numbers = #tpu.dot_dimension_numbers<[1], [0], [0], [1], [0, 0, 1, 1], [], []>} : vector<8x8xf32>, vector<8x1xf32>, vector<8x1xf32> -> vector<8x1xf32>
    %cst_56 = arith.constant 3.125000e-02 : f32
    %80 = vector.broadcast %cst_56 : f32 to vector<8x1xf32>
    %81 = arith.mulf %78, %80 : vector<8x1xf32>
    %cst_57 = arith.constant 3.125000e-02 : f32
    %82 = vector.broadcast %cst_57 : f32 to vector<8x1xf32>
    %83 = arith.mulf %79, %82 : vector<8x1xf32>
    %84 = arith.mulf %81, %81 : vector<8x1xf32>
    %85 = arith.subf %83, %84 : vector<8x1xf32>
    %cst_58 = arith.constant 0.000000e+00 : f32
    %86 = vector.broadcast %cst_58 : f32 to vector<8x1xf32>
    %87 = arith.maximumf %85, %86 : vector<8x1xf32>
    %88 = vector.broadcast %81 : vector<8x1xf32> to vector<8x32xf32>
    %89 = arith.subf %72, %88 : vector<8x32xf32>
    %cst_59 = arith.constant 9.99999974E-6 : f32
    %90 = vector.broadcast %cst_59 : f32 to vector<8x1xf32>
    %91 = arith.addf %87, %90 : vector<8x1xf32>
    %92 = math.rsqrt %91 : vector<8x1xf32>
    %93 = vector.broadcast %92 : vector<8x1xf32> to vector<8x32xf32>
    %94 = arith.mulf %89, %93 : vector<8x32xf32>
    %95 = vector.broadcast %3 : vector<8x1xf32> to vector<8x32xf32>
    %96 = arith.mulf %94, %95 : vector<8x32xf32>
    %97 = vector.broadcast %4 : vector<8x1xf32> to vector<8x32xf32>
    %98 = arith.addf %96, %97 : vector<8x32xf32>
    %cst_60 = arith.constant 0.000000e+00 : f32
    %99 = vector.broadcast %cst_60 : f32 to vector<8x32xf32>
    %100 = arith.cmpf oge, %98, %99 : vector<8x32xf32>
    %101 = vector.broadcast %0 : f32 to vector<8x32xf32>
    %102 = arith.mulf %101, %98 : vector<8x32xf32>
    %103 = arith.select %100, %98, %102 : vector<8x32xi1>, vector<8x32xf32>
    %104 = arith.addf %65, %103 : vector<8x32xf32>
    %cst_61 = arith.constant 5.000000e-01 : f32
    %105 = vector.broadcast %cst_61 : f32 to vector<8x32xf32>
    %106 = arith.mulf %104, %105 : vector<8x32xf32>
    %c1_62 = arith.constant 1 : index
    %c0_63 = arith.constant 0 : index
    %c0_64 = arith.constant 0 : index
    %107 = vector.load %arg9[%c1_62, %c0_63, %c0_64] : memref<2x8x32xf32, #tpu.memory_space<vmem>>, vector<1x8x32xf32>
    %108 = vector.shape_cast %107 : vector<1x8x32xf32> to vector<8x32xf32>
    %109 = vector.shape_cast %106 : vector<8x32xf32> to vector<1x8x32xf32>
    tpu.vector_store %arg9[%c1_62, %c0_63, %c0_64], %109 {strides = array<i32>} : memref<2x8x32xf32, #tpu.memory_space<vmem>>, vector<1x8x32xf32>,
    return
  }
  func.func @transform_0(%arg0: i32) -> (i32, i32, i32) {
    %c0_i32 = arith.constant 0 : i32
    %c0_i32_0 = arith.constant 0 : i32
    %c0_i32_1 = arith.constant 0 : i32
    return %arg0, %c0_i32, %c0_i32_0 : i32, i32, i32
  }
  func.func @transform_1(%arg0: i32) -> (i32, i32, i32) {
    %c0_i32 = arith.constant 0 : i32
    %c0_i32_0 = arith.constant 0 : i32
    %c0_i32_1 = arith.constant 0 : i32
    %c0_i32_2 = arith.constant 0 : i32
    return %c0_i32, %c0_i32_0, %c0_i32_1 : i32, i32, i32
  }
  func.func @transform_2(%arg0: i32) -> (i32, i32) {
    %c0_i32 = arith.constant 0 : i32
    %c0_i32_0 = arith.constant 0 : i32
    %c0_i32_1 = arith.constant 0 : i32
    return %c0_i32, %c0_i32_0 : i32, i32
  }
  func.func @transform_3(%arg0: i32) -> (i32, i32) {
    %c0_i32 = arith.constant 0 : i32
    %c0_i32_0 = arith.constant 0 : i32
    %c0_i32_1 = arith.constant 0 : i32
    return %c0_i32, %c0_i32_0 : i32, i32
  }
  func.func @transform_4(%arg0: i32) -> (i32, i32) {
    %c0_i32 = arith.constant 0 : i32
    %c0_i32_0 = arith.constant 0 : i32
    %c0_i32_1 = arith.constant 0 : i32
    return %c0_i32, %c0_i32_0 : i32, i32
  }
  func.func @transform_5(%arg0: i32) -> (i32, i32) {
    %c0_i32 = arith.constant 0 : i32
    %c0_i32_0 = arith.constant 0 : i32
    %c0_i32_1 = arith.constant 0 : i32
    return %c0_i32, %c0_i32_0 : i32, i32
  }
  func.func @transform_6(%arg0: i32) -> (i32, i32) {
    %c0_i32 = arith.constant 0 : i32
    %c0_i32_0 = arith.constant 0 : i32
    %c0_i32_1 = arith.constant 0 : i32
    return %c0_i32, %c0_i32_0 : i32, i32
  }
  func.func @transform_7(%arg0: i32) -> i32 {
    %c0_i32 = arith.constant 0 : i32
    %c0_i32_0 = arith.constant 0 : i32
    return %c0_i32 : i32
  }
  func.func @transform_8(%arg0: i32) -> (i32, i32, i32) {
    %c0_i32 = arith.constant 0 : i32
    %c0_i32_0 = arith.constant 0 : i32
    %c0_i32_1 = arith.constant 0 : i32
    return %arg0, %c0_i32, %c0_i32_0 : i32, i32, i32
  }
}

</mosaic_0001>

<bundles_post_ra>
// kernel: tpu_custom_call.1
= control target key start
LH: loop header
LB: loop body
LE: loop exit
PB: predicated region body
PF: predicated region fallthrough
CT: control target
= control target key end

     0   :  { %14 = vsyncpa [#allocation4], 0  ;;  %s1422_s0 = inlined_call_operand.vmem [shape: f32[2,8,16], index: 0, kind: input, shape index: {}]   ;;  %s1423_s1 = inlined_call_operand.hbm [shape: f32[3,16,32], index: 1, kind: input, shape index: {}]   ;;  %s1424_s2 = inlined_call_operand.vmem [shape: f32[8,24], index: 2, kind: input, shape index: {}]   ;;  %s1425_s3 = inlined_call_operand.vmem [shape: f32[8,1], index: 3, kind: input, shape index: {}]   ;;  %s1426_s4 = inlined_call_operand.vmem [shape: f32[8,1], index: 4, kind: input, shape index: {}]   ;;  %s1427_s5 = inlined_call_operand.vmem [shape: f32[8,1], index: 5, kind: input, shape index: {}]   ;;  %s1428_s6 = inlined_call_operand.vmem [shape: f32[8,8], index: 6, kind: input, shape index: {}]   ;;  %s1429_s7 = inlined_call_operand.<no memory space> [shape: f32[1], index: 7, kind: input, shape index: {}]   ;;  %s1430_s8 = inlined_call_operand.hbm [shape: f32[2,8,32], index: 8, kind: output, shape index: {}]  }
   0x1   :  { %15 = vsyncpa [#allocation5], 0  ;;  %s1239_s27 = smov [#allocation3]   ;;  %s1191_s9 = scalar_lea.hbm %s1423_s1, 768 }
   0x2   :  { %s23_s28 = sshll.u32 %s1239_s27, 4  ;;  %p1192_p0 = scmp.ne.s32.totalorder %s1423_s1, %s1191_s9  ;;  %s24_s28 = int_to_ptr.vmem [resolvable:$true] %s23_s28 }
   0x3   :  { %p1195_p1 = scmp.lt.u32.totalorder %s1191_s9, %s1423_s1 }
   0x5   :  { %p1197_p2 = pnand %p1195_p1, %p1192_p0 }
   0x7   :  { %1200 = shalt.err (!%p1197_p2)
}
   0x8   :  { %s1201_s14 = scalar_lea.vmem %s24_s28, 768  ;;  %p1206_p4 = scmp.lt.s32.totalorder %s24_s28, %s24_s28 }
   0x9   :  { %p1202_p3 = scmp.ne.s32.totalorder %s24_s28, %s1201_s14  ;;  %p1207_p5 = scmp.lt.s32.totalorder %s1201_s14, %s1201_s14 }
   0xb   :  { %p1208_p6 = por %p1207_p5, %p1206_p4 }
   0xd   :  { %p1209_p7 = pnand %p1208_p6, %p1202_p3 }
   0xf   :  { %1212 = shalt.err (!%p1209_p7)
}
  0x10   :  { %s1240_s15 = smov 128   ;;  %s1241_s16 = smov 8  }
  0x11   :  { %29 = dma.hbm_to_vmem [thread:$0]  %s1423_s1, 768, %s24_s28, [#allocation4], %s1240_s15, %s1240_s15, %s1241_s16  }
  0x12   :  { %1235 = dma.done.wait [#allocation4], 768  }
  0x13   :  { %1236 = vsyncadd [#allocation4], 4294966528  ;;  %v1242_v0 = vmov 0.0|0.0   ;;  %vm1243_vm0 = vmmov 0   ;;  %v1244_v1 = vmov 0.0   ;;  %v52_v2 = vld [vmem:[#allocation3] sm:$0xff] }
  0x14   :  { %1153 = vmatprep.subr.bf16.mxu0 %v1242_v0  ;;  %1156 = vmatprep.subr.bf16.mxu1 %v1242_v0  ;;  %v53_v3 = vld [vmem:[#allocation3 + $0x8] sm:$0xff]  ;;  %v129_v4 = vld [vmem:[#allocation3 + $0x10] sm:$0xff]  ;;  %v130_v6 = vld [vmem:[#allocation3 + $0x18] sm:$0xff]  ;;  %vm54_vm1 = vcmask 130048   ;;  %v1245_v13 = vmov 0   ;;  %vm279_vm2 = vcmask 195584  }
  0x15   :  { %1077 = vmatprep.mubr.msk.f32.mxu0 %vm1243_vm0, %v1244_v1  ;;  %1084 = vmatprep.mubr.msk.f32.mxu1 %vm1243_vm0, %v1244_v1  ;;  %v1154_v5 = vpack.c.bf16 %v53_v3, %v52_v2  ;;  %v202_v7 = vld [vmem:[#allocation3 + $0x20] sm:$0xff]  ;;  %v1157_v8 = vpack.c.bf16 %v130_v6, %v129_v4  ;;  %v203_v9 = vld [vmem:[#allocation3 + $0x28] sm:$0xff]  ;;  %vm353_vm3 = vcmask 261120   ;;  %vm361_vm4 = vcmask 64512  }
  0x16   :  { %v51_v10 = vld [vmem:[%s1422_s0] sm:$0xff]  ;;  %v1160_v11 = vpack.c.bf16 %v203_v9, %v202_v7  ;;  %1185 = vset.pattern.permute.xlu0 %v1245_v13  ;;  %1186 = vset.pattern.permute.xlu1 %v1245_v13  ;;  %v1032_v32 = vld [vmem:[%s1422_s0 + $0x8] sm:$0xff] }
  0x17   :  { %1155 = vmatpush3.bf16.msra.mxu0 %v1154_v5  ;;  %1158 = vmatpush3.bf16.msra.mxu1 %v1157_v8  ;;  %v47_v12 = vld [vmem:[%s1425_s3] sm:$0xff] }
  0x18   :  { %1159 = vmatprep.subr.bf16.mxu0 %v1242_v0  ;;  %1162 = vmatprep.subr.bf16.mxu1 %v1242_v0  ;;  %v46_v21 = vld [vmem:[%s1424_s2] sm:$0xff] }
  0x19   :  { %276 = vperm.xlu0 %1185, %v47_v12   ;;  %v1352_v29 = vld [vmem:[%s1428_s6] sm:$0xff] }
  0x1a   :  { %1078 = vmatmul.mubr.msk.f32.vlgmr.msra.gmra.mrb[0].mxu0 %vm54_vm1, %v51_v10  ;;  %1085 = vmatmul.mubr.msk.f32.vlgmr.msra.gmra.mrb[0].mxu1 %vm54_vm1, %v51_v10  ;;  %v48_v63 = vld [vmem:[%s1426_s4] sm:$0xff] }
  0x1b   :  { %1161 = vmatpush3.bf16.msra.mxu0 %v1160_v11  ;;  %1091 = vmatprep.mubr.msk.f32.mxu0 %vm1243_vm0, %v1244_v1 }
  0x1c   :  { %1100 = vmatprep.mubr.msk.f32.mxu1 %vm1243_vm0, %v1244_v1  ;;  %1103 = vmatprep.subr.mxu0 %v1244_v1 }
  0x1e   :  { %1092 = vmatmul.mubr.msk.f32.vlgmr.msra.gmra.mrb[2].mxu0 %vm54_vm1, %v51_v10 }
  0x1f   :  { %1105 = vmatprep.mubr.msk.f32.mxu0 %vm1243_vm0, %v1244_v1 }
  0x98   :  { %v277_v22 = vpop.permute.xlu0 %276 }
  0xed   :  { %v124_v14 = vpop.f32.mrb[0].mxu0  ;;  %v1331_v15 = vpop.f32.mrb[0].mxu1 }
  0xee   :  { %v1079_v16 = vpop.f32.mrb[1].mxu0  ;;  %v1163_v17 = vpack.c.bf16 %v1331_v15, %v124_v14  ;;  %v1086_v18 = vpop.f32.mrb[1].mxu1 }
  0xef   :  { %v537_v16 = vstv %s1429_s7 }
  0xf0   :  { %1164 = vmatpush3.bf16.msra.mxu1 %v1163_v17 }
  0xf1   :  { %v270_v19 = vpop.f32.mrb[2].mxu0  ;;  %1098 = vmatprep.subr.mxu1 %v1244_v1 }
  0xf2   :  { %v1093_v20 = vpop.f32.mrb[3].mxu0 }
  0xf4   :  { %1099 = vmatpush3.msra.mxu1 %v270_v19 }
  0xf5   :  { %1101 = vmatmul.mubr.msk.f32.vlgmr.msra.gmra.mrb[2].mxu1 %vm279_vm2, %v46_v21  ;;  %1108 = vmatprep.subr.mxu1 %v1244_v1 }
  0xf6   :  { %1110 = vmatprep.mubr.msk.f32.mxu1 %vm1243_vm0, %v1244_v1 }
 0x1c8   :  { %v349_v23 = vpop.f32.mrb[2].mxu1 }
 0x1c9   :  { %v1342_v24 = vadd.f32 %v349_v23, %v277_v22  ;;  %v1102_v25 = vpop.f32.mrb[3].mxu1 }
 0x1cb   :  { %v354_v26 = vsel %vm353_vm3, %v1342_v24, 0.0  ;;  %v357_v27 = vmul.f32 %v1342_v24, %v1342_v24 }
 0x1cc   :  { %355 = vadd.xlane.f32.xlu0 %v354_v26 }
 0x1cd   :  { %v358_v28 = vsel %vm353_vm3, %v357_v27, 0.0 }
 0x1ce   :  { %359 = vadd.xlane.f32.xlu1 %v358_v28 }
 0x259   :  { %v356_v30 = vpop.xlane.xlu0 %355 }
 0x25a   :  { %1104 = vmatpush3.msra.mxu0 %v356_v30 }
 0x25b   :  { %v360_v31 = vpop.xlane.xlu1 %359  ;;  %1106 = vmatmul.mubr.msk.f32.vlgmr.msra.gmra.mrb[4].mxu0 %vm361_vm4, %v1352_v29  ;;  %1165 = vmatprep.subr.bf16.mxu0 %v1242_v0 }
 0x25c   :  { %1109 = vmatpush3.msra.mxu1 %v360_v31  ;;  %1167 = vmatpush3.bf16.msra.mxu0 %v1154_v5 }
 0x25d   :  { %1111 = vmatmul.mubr.msk.f32.vlgmr.msra.gmra.mrb[4].mxu1 %vm361_vm4, %v1352_v29  ;;  %1168 = vmatprep.subr.bf16.mxu1 %v1242_v0 }
 0x25e   :  { %1170 = vmatpush3.bf16.msra.mxu1 %v1157_v8  ;;  %1117 = vmatprep.mubr.msk.f32.mxu0 %vm1243_vm0, %v1244_v1 }
 0x25f   :  { %1118 = vmatmul.mubr.msk.f32.vlgmr.msra.gmra.mrb[6].mxu0 %vm54_vm1, %v1032_v32  ;;  %1124 = vmatprep.mubr.msk.f32.mxu1 %vm1243_vm0, %v1244_v1 }
 0x260   :  { %1171 = vmatprep.subr.bf16.mxu0 %v1242_v0  ;;  %1131 = vmatprep.mubr.msk.f32.mxu0 %vm1243_vm0, %v1244_v1 }
 0x261   :  { %1125 = vmatmul.mubr.msk.f32.vlgmr.msra.gmra.mrb[6].mxu1 %vm54_vm1, %v1032_v32  ;;  %1173 = vmatpush3.bf16.msra.mxu0 %v1160_v11 }
 0x262   :  { %1174 = vmatprep.subr.bf16.mxu1 %v1242_v0  ;;  %1140 = vmatprep.mubr.msk.f32.mxu1 %vm1243_vm0, %v1244_v1 }
 0x263   :  { %1143 = vmatprep.subr.mxu0 %v1244_v1 }
 0x264   :  { %1132 = vmatmul.mubr.msk.f32.vlgmr.msra.gmra.mrb[8].mxu0 %vm54_vm1, %v1032_v32 }
 0x265   :  { %1145 = vmatprep.mubr.msk.f32.mxu0 %vm1243_vm0, %v1244_v1 }
 0x32e   :  { %v431_v33 = vpop.f32.mrb[4].mxu0 }
 0x32f   :  { %v505_v34 = vmul.f32 0.03125, %v431_v33  ;;  %v1107_v35 = vpop.f32.mrb[5].mxu0 }
 0x330   :  { %v501_v36 = vpop.f32.mrb[4].mxu1 }
 0x331   :  { %v507_v37 = vmul.f32 %v505_v34, %v505_v34  ;;  %v506_v38 = vmul.f32 0.03125, %v501_v36  ;;  %v1112_v39 = vpop.f32.mrb[5].mxu1 }
 0x332   :  { %v616_v40 = vpop.f32.mrb[6].mxu0 }
 0x333   :  { %v508_v41 = vsub.f32 %v506_v38, %v507_v37  ;;  %v1119_v42 = vpop.f32.mrb[7].mxu0 }
 0x334   :  { %v1379_v43 = vpop.f32.mrb[6].mxu1 }
 0x335   :  { %v1175_v44 = vpack.c.bf16 %v1379_v43, %v616_v40  ;;  %v1126_v45 = vpop.f32.mrb[7].mxu1  ;;  %v509_v54 = vmax.f32 %v508_v41, 0.0 }
 0x337   :  { %1176 = vmatpush3.bf16.msra.mxu1 %v1175_v44  ;;  %v760_v46 = vpop.f32.mrb[8].mxu0  ;;  %v516_v55 = vadd.f32 1e-05, %v509_v54 }
 0x338   :  { %v1133_v47 = vpop.f32.mrb[9].mxu0  ;;  %1138 = vmatprep.subr.mxu1 %v1244_v1 }
 0x339   :  { %1187 = vrsqrt.f32 %v516_v55 }
 0x33b   :  { %1139 = vmatpush3.msra.mxu1 %v760_v46 }
 0x33c   :  { %1141 = vmatmul.mubr.msk.f32.vlgmr.msra.gmra.mrb[8].mxu1 %vm279_vm2, %v46_v21 }
 0x343   :  { %v1188_v56 = vpop.eup %1187 }
 0x40f   :  { %v830_v48 = vpop.f32.mrb[8].mxu1 }
 0x410   :  { %v831_v49 = vadd.f32 %v830_v48, %v277_v22  ;;  %v1142_v50 = vpop.f32.mrb[9].mxu1 }
 0x412   :  { %v834_v51 = vsel %vm353_vm3, %v831_v49, 0.0  ;;  %v837_v52 = vmul.f32 %v831_v49, %v831_v49 }
 0x413   :  { %835 = vadd.xlane.f32.xlu1 %v834_v51 }
 0x414   :  { %v838_v53 = vsel %vm353_vm3, %v837_v52, 0.0 }
 0x417   :  { %839 = vadd.xlane.f32.xlu1 %v838_v53 }
 0x428   :  { %512 = vperm.xlu1 %1186, %v505_v34  }
 0x42c   :  { %520 = vperm.xlu1 %1186, %v1188_v56  }
 0x4a0   :  { %v836_v57 = vpop.xlane.xlu1 %835 }
 0x4a1   :  { %1144 = vmatpush3.msra.mxu0 %v836_v57 }
 0x4a2   :  { %1146 = vmatmul.mubr.msk.f32.vlgmr.msra.gmra.mrb[10].mxu0 %vm361_vm4, %v1352_v29  ;;  %1148 = vmatprep.subr.mxu0 %v1244_v1 }
 0x4a3   :  { %1150 = vmatprep.mubr.msk.f32.mxu0 %vm1243_vm0, %v1244_v1  ;;  %v49_v1 = vld [vmem:[%s1427_s5] sm:$0xff]  ;;  %s1246_s5 = smov [#allocation6]  }
 0x4a4   :  { %v840_v58 = vpop.xlane.xlu1 %839  ;;  %s1014_s7 = sshll.u32 %s1246_s5, 4  ;;  %s1015_s7 = int_to_ptr.vmem [resolvable:$true] %s1014_s7 }
 0x4a5   :  { %1149 = vmatpush3.msra.mxu0 %v840_v58  ;;  %s1213_s29 = scalar_lea.vmem %s1015_s7, 256  ;;  %p1218_p9 = scmp.lt.s32.totalorder %s1015_s7, %s1015_s7 }
 0x4a6   :  { %1151 = vmatmul.mubr.msk.f32.vlgmr.msra.gmra.mrb[12].mxu0 %vm361_vm4, %v1352_v29  ;;  %p1214_p8 = scmp.ne.s32.totalorder %s1015_s7, %s1213_s29  ;;  %p1219_p10 = scmp.lt.s32.totalorder %s1213_s29, %s1213_s29 }
 0x4a8   :  { %v513_v8 = vpop.permute.xlu1 %512  ;;  %p1220_p11 = por %p1219_p10, %p1218_p9 }
 0x4a9   :  { %v515_v11 = vsub.f32 %v1342_v24, %v513_v8 }
 0x4aa   :  { %p1221_p12 = pnand %p1220_p11, %p1214_p8 }
 0x4ac   :  { %v521_v9 = vpop.permute.xlu1 %520 }
 0x4ad   :  { %v523_v13 = vmul.f32 %v521_v9, %v515_v11 }
 0x575   :  { %v907_v59 = vpop.f32.mrb[10].mxu0 }
 0x576   :  { %v981_v60 = vmul.f32 0.03125, %v907_v59  ;;  %v1147_v61 = vpop.f32.mrb[11].mxu0 }
 0x578   :  { %988 = vperm.xlu1 %1186, %v981_v60   ;;  %v983_v0 = vmul.f32 %v981_v60, %v981_v60 }
 0x579   :  { %v977_v62 = vpop.f32.mrb[12].mxu0 }
 0x57a   :  { %v982_v2 = vmul.f32 0.03125, %v977_v62  ;;  %v1152_v3 = vpop.f32.mrb[13].mxu0 }
 0x57c   :  { %v984_v4 = vsub.f32 %v982_v2, %v983_v0  ;;  %526 = vperm.xlu1 %1186, %v48_v63  }
 0x57e   :  { %v985_v5 = vmax.f32 %v984_v4, 0.0 }
 0x580   :  { %v992_v6 = vadd.f32 1e-05, %v985_v5  ;;  %532 = vperm.xlu1 %1186, %v49_v1  }
 0x582   :  { %1189 = vrsqrt.f32 %v992_v6 }
 0x58c   :  { %v1190_v7 = vpop.eup %1189 }
 0x58d   :  { %996 = vperm.xlu0 %1185, %v1190_v7  }
 0x5f7   :  { %v989_v10 = vpop.permute.xlu1 %988 }
 0x5f8   :  { %v991_v23 = vsub.f32 %v831_v49, %v989_v10 }
 0x5fb   :  { %v527_v12 = vpop.permute.xlu1 %526 }
 0x5fc   :  { %v529_v14 = vmul.f32 %v527_v12, %v523_v13 }
 0x5ff   :  { %v533_v17 = vpop.permute.xlu1 %532 }
 0x600   :  { %v535_v18 = vadd.f32 %v533_v17, %v529_v14 }
 0x602   :  { %vm536_vm5 = vcmp.ge.f32.partialorder %v535_v18, 0.0  ;;  %v538_v19 = vmul.f32 %v537_v16, %v535_v18 }
 0x604   :  { %v539_v20 = vsel %vm536_vm5, %v535_v18, %v538_v19 }
 0x605   :  { %v540_v21 = vadd.f32 %v539_v20, %v1331_v15 }
 0x607   :  { %v541_v22 = vmul.f32 0.5, %v540_v21 }
 0x609   :  { %542 = vst.msk [vmem:[#allocation6] sm:$0xff] %vm353_vm3, %v541_v22 }
 0x60c   :  { %v997_v25 = vpop.permute.xlu0 %996 }
 0x60d   :  { %v999_v24 = vmul.f32 %v997_v25, %v991_v23 }
 0x60f   :  { %v1000_v26 = vmul.f32 %v999_v24, %v527_v12 }
 0x611   :  { %v1001_v27 = vadd.f32 %v1000_v26, %v533_v17 }
 0x613   :  { %vm1002_vm6 = vcmp.ge.f32.partialorder %v1001_v27, 0.0  ;;  %v1003_v28 = vmul.f32 %v1001_v27, %v537_v16 }
 0x615   :  { %v1004_v29 = vsel %vm1002_vm6, %v1001_v27, %v1003_v28 }
 0x616   :  { %v1005_v30 = vadd.f32 %v1004_v29, %v1379_v43 }
 0x618   :  { %v1006_v31 = vmul.f32 0.5, %v1005_v30 }
 0x61a   :  { %1008 = vst.msk [vmem:[#allocation6 + $0x8] sm:$0xff] %vm353_vm3, %v1006_v31 }
 0x61b   :  { %1224 = shalt.err (!%p1221_p12)
}
 0x61c   :  { %s1225_s10 = scalar_lea.hbm %s1430_s8, 256 }
 0x61d   :  { %p1226_p13 = scmp.ne.s32.totalorder %s1430_s8, %s1225_s10  ;;  %p1229_p0 = scmp.lt.u32.totalorder %s1225_s10, %s1430_s8 }
 0x61f   :  { %p1231_p1 = pnand %p1229_p0, %p1226_p13 }
 0x621   :  { %1234 = shalt.err (!%p1231_p1)
}
 0x622   :  { %1020 = dma.vmem_to_hbm [thread:$0]  %s1015_s7, 256, %s1430_s8, [#allocation5], %s1240_s15, %s1240_s15, %s1241_s16  }
 0x623   :  { %1237 = dma.done.wait [#allocation5], 256  }
 0x624   :  { %1238 = vsyncadd [#allocation5], 4294967040 }
 0x625   :  { %1024 = vsyncpa [#allocation4], 1 }
 0x626   :  { %1025 = vsyncpa [#allocation5], 1 }

</bundles_post_ra>
